<compile_context>
chip_gen: v7x
topology: tpu7x:2x2x1
jax: 0.10.0
libtpu: 0.0.40
codegen_flags: <defaults>
</compile_context>

<pallas_src>
import functools

import jax
import jax.numpy as jnp
from jax import lax
from jax.experimental import pallas as pl
from jax.experimental.pallas import tpu as pltpu


def _round_up(a: int, b: int) -> int:
    return -(-a // b) * b


def _spec(block_shape, index_map, buffers=None):
    """BlockSpec, optionally with an explicit pipeline buffer count (Buffered)."""
    if buffers is not None and hasattr(pl, "Buffered"):
        try:
            return pl.BlockSpec(block_shape, index_map,
                                pipeline_mode=pl.Buffered(buffers))
        except TypeError:  # older jax without BlockSpec.pipeline_mode
            pass
    return pl.BlockSpec(block_shape, index_map)


def _tdnn_kernel(*refs, T, tT, C, odim, offsets, halo_blk,
                 has_pre, has_post, use_window, mask_time, eps):
    # refs (in order): x_main, [pre_halo], [post_halo], weights, params, out, [window]
    i = 0
    x_ref = refs[i]; i += 1
    pre_ref = refs[i] if has_pre else None
    i += int(has_pre)
    post_ref = refs[i] if has_post else None
    i += int(has_post)
    w_ref, p_ref, o_ref = refs[i], refs[i + 1], refs[i + 2]
    win_ref = refs[i + 3] if use_window else None

    t = pl.program_id(1)
    pre_rows = halo_blk if has_pre else 0

    def store_piece(dst, rows, src_ref):
        # Cast to bf16 in-kernel (no wrapper cast pass) and emulate Conv1d zero
        # padding / zero out garbage rows from ragged or clamped halo blocks.
        vals = src_ref[...].astype(jnp.bfloat16)
        if mask_time:
            r = lax.broadcasted_iota(jnp.int32, (rows, 1), 0)
            gidx = t * tT - pre_rows + dst + r
            vals = jnp.where((gidx >= 0) & (gidx < T), vals,
                             jnp.zeros_like(vals))
        win_ref[dst:dst + rows, :] = vals

    if use_window:
        if has_pre:
            store_piece(0, halo_blk, pre_ref)
        store_piece(pre_rows, tT, x_ref)
        if has_post:
            store_piece(pre_rows + tT, halo_blk, post_ref)

        def operand(g):
            off = offsets[g]
            return win_ref[off:off + tT, :]
    else:
        xb = x_ref[...].astype(jnp.bfloat16)

        def operand(g):
            return xb

    # ceil(K/stride) accumulating MXU matmuls; every operand is a full-C-lane slice
    # (weights were grouped/zero-padded per row offset in the wrapper).
    acc = jnp.zeros((tT, odim), jnp.float32)
    for g in range(len(offsets)):
        acc = acc + jnp.dot(operand(g), w_ref[g * C:(g + 1) * C, :],
                            preferred_element_type=jnp.float32)

    acc = acc + p_ref[0:1, :]       # conv bias
    acc = jnp.maximum(acc, 0.0)     # ReLU

    # Fused LayerNorm statistics (single pass).  For wide odim route the two row
    # sums through the MXU (ones matmul) instead of the XLU cross-lane reduction.
    inv_n = 1.0 / odim
    if odim >= 128:
        ones = jnp.ones((odim, 1), jnp.float32)
        s1 = jnp.dot(acc, ones, preferred_element_type=jnp.float32)
        s2 = jnp.dot(acc * acc, ones, preferred_element_type=jnp.float32)
    else:
        s1 = jnp.sum(acc, axis=-1, keepdims=True)
        s2 = jnp.sum(acc * acc, axis=-1, keepdims=True)
    mean = s1 * inv_n
    # One-pass E[x^2] - mean^2 (reference is two-pass); clamp tiny negatives.
    var = jnp.maximum(s2 * inv_n - mean * mean, 0.0)
    norm = (acc - mean) * lax.rsqrt(var + eps)
    o_ref[...] = (norm * p_ref[1:2, :] + p_ref[2:3, :]).astype(o_ref.dtype)


def tdnn_forward(x, ilens, weight, bias, gamma, beta, *,
                 half_context: int = 1, dilation: int = 1, stride: int = 1,
                 eps: float = 1e-5, time_tile: int = 512,
                 out_dtype=None, input_buffer_count=None):
    """x: (N, T, idim); ilens: (N,) int32; weight: (odim, idim, K). -> (out, ilens)."""
    N, T, idim = x.shape
    K = 2 * half_context + 1
    odim = weight.shape[0]
    S = stride
    if S > 1:
        dilation = 1
        P = 0
        ilens = ilens // S
    else:
        P = half_context * dilation
    d = dilation
    T_out = (T + 2 * P - d * (K - 1) - 1) // S + 1
    out_dtype = x.dtype if out_dtype is None else out_dtype

    if S > 1:
        # Phase-fold the stride into the lane axis: (N, T, idim) -> (N, T//S, S*idim).
        # Row-major reshape is free; a pad copy is needed only when S does not divide T.
        if T % S:
            # TODO(synk): avoid this pad copy via strided in-kernel row reads (pl.ds).
            x = jnp.pad(x, ((0, 0), (0, S - T % S), (0, 0)))
        Tr = x.shape[1] // S
        C = S * idim
        x_r = x.reshape(N, Tr, C)
        G = -(-K // S)
        halo_need = G - 1
        has_pre = False
        mask_time = False
    else:
        Tr, C, G = T, idim, K
        halo_need = P
        has_pre = P > 0
        mask_time = P > 0          # left pad + ragged tail need in-kernel zeros
        x_r = x
    has_post = halo_need > 0
    use_window = has_pre or has_post or mask_time
    assert use_window or G == 1

    halo_blk = _round_up(max(halo_need, 1), 16)       # bf16-friendly row quantum
    tT = _round_up(min(time_tile, T_out), halo_blk)   # time tile (multiple of halo_blk)
    nT = -(-T_out // tT)
    hs = tT // halo_blk
    last_blk = (Tr - 1) // halo_blk

    # Static window-row offset of each tap group.
    pre_rows = halo_blk if has_pre else 0
    if S > 1:
        offsets = tuple(range(G))
    else:
        offsets = tuple(pre_rows - P + g * d for g in range(G))

    # Weights regrouped as (row-offset group, stride phase, idim) rows; missing taps
    # in the last group are zero so every group matmul uses the full C-lane slice.
    S_eff = S if S > 1 else 1
    w_t = jnp.transpose(weight, (2, 1, 0))                       # (K, idim, odim)
    if G * S_eff > K:
        w_t = jnp.concatenate(
            [w_t, jnp.zeros((G * S_eff - K, idim, odim), w_t.dtype)], axis=0)
    w2 = w_t.reshape(G * C, odim).astype(jnp.bfloat16)
    params = jnp.stack([bias, gamma, beta]).astype(jnp.float32)  # (3, odim)

    in_specs = [_spec((None, tT, C), lambda n, t: (n, t, 0), input_buffer_count)]
    operands = [x_r]
    if has_pre:
        in_specs.append(pl.BlockSpec(
            (None, halo_blk, C),
            lambda n, t: (n, jnp.maximum(t * hs - 1, 0), 0)))
        operands.append(x_r)
    if has_post:
        in_specs.append(pl.BlockSpec(
            (None, halo_blk, C),
            lambda n, t: (n, jnp.minimum((t + 1) * hs, last_blk), 0)))
        operands.append(x_r)
    # Grid-invariant operands: constant index map, single-buffered to save VMEM.
    in_specs.append(_spec((G * C, odim), lambda n, t: (0, 0), 1))
    in_specs.append(_spec((3, odim), lambda n, t: (0, 0), 1))
    operands += [w2, params]

    scratch_shapes = []
    if use_window:
        win_rows = pre_rows + tT + (halo_blk if has_post else 0)
        scratch_shapes.append(pltpu.VMEM((win_rows, C), jnp.bfloat16))

    kernel = functools.partial(
        _tdnn_kernel, T=T, tT=tT, C=C, odim=odim, offsets=offsets,
        halo_blk=halo_blk, has_pre=has_pre, has_post=has_post,
        use_window=use_window, mask_time=mask_time, eps=eps)

    out = pl.pallas_call(
        kernel,
        out_shape=jax.ShapeDtypeStruct((N, T_out, odim), out_dtype),
        grid_spec=pltpu.PrefetchScalarGridSpec(
            num_scalar_prefetch=0,
            grid=(N, nT),
            in_specs=in_specs,
            out_specs=pl.BlockSpec((None, tT, odim), lambda n, t: (n, t, 0)),
            scratch_shapes=scratch_shapes),
        compiler_params=pltpu.CompilerParams(
            dimension_semantics=("parallel", "parallel"),
            vmem_limit_bytes=32 * 1024 * 1024,
        ),
    )(*operands)
    return out, ilens


def _reference(x, ilens, weight, bias, gamma, beta, *,
               half_context=1, dilation=1, stride=1, eps=1e-5):
    """Pure-JAX reference mirroring the PyTorch module (f32 throughout)."""
    if stride > 1:
        dilation = 1
        padding = 0
        ilens = ilens // stride
    else:
        padding = half_context * dilation
    xin = jnp.transpose(x, (0, 2, 1))
    y = lax.conv_general_dilated(
        xin, weight, window_strides=(stride,), padding=[(padding, padding)],
        rhs_dilation=(dilation,),
        dimension_numbers=("NCH", "OIH", "NCH"))
    y = y + bias[None, :, None]
    y = jnp.maximum(y, 0.0)
    y = jnp.transpose(y, (0, 2, 1))
    mean = jnp.mean(y, axis=-1, keepdims=True)
    var = jnp.mean((y - mean) ** 2, axis=-1, keepdims=True)
    y = (y - mean) * lax.rsqrt(var + eps)
    return y * gamma + beta, ilens


if __name__ == "__main__":
    key = jax.random.PRNGKey(0)

    def run_case(name, *, stride, T, half_context=1, dilation=1, time_tile=512):
        N, idim, odim = 2, 8, 16
        K = 2 * half_context + 1
        seed = jax.random.fold_in(key, hash(name) % (2 ** 31))
        k1, k2, k3, k4, k5 = jax.random.split(seed, 5)
        x = jax.random.normal(k1, (N, T, idim), dtype=jnp.float32)
        ilens = jnp.array([T, T - 3], dtype=jnp.int32)

        bound = 1.0 / (idim * K) ** 0.5
        weight = jax.random.uniform(k2, (odim, idim, K), jnp.float32, -bound, bound)
        bias = jax.random.uniform(k3, (odim,), jnp.float32, -bound, bound)
        gamma = 1.0 + 0.1 * jax.random.normal(k4, (odim,), jnp.float32)
        beta = 0.1 * jax.random.normal(k5, (odim,), jnp.float32)

        out, out_lens = tdnn_forward(
            x, ilens, weight, bias, gamma, beta,
            half_context=half_context, dilation=dilation, stride=stride,
            time_tile=time_tile)
        out = jax.block_until_ready(out)

        ref, ref_lens = _reference(
            x, ilens, weight, bias, gamma, beta,
            half_context=half_context, dilation=dilation, stride=stride)

        assert out.shape == ref.shape, (name, out.shape, ref.shape)
        max_err = float(jnp.max(jnp.abs(out - ref)))
        # bf16 matmul operands -> loosened tolerance vs the f32 reference
        assert jnp.allclose(out, ref, atol=5e-2, rtol=5e-2), (name, max_err)
        assert jnp.array_equal(out_lens, ref_lens), name

    run_case("stride1", stride=1, T=16)
    run_case("stride2", stride=2, T=34)
    run_case("dil2_multitile", stride=1, T=80, dilation=2, time_tile=32)
    run_case("stride3_nohalo", stride=3, T=36)
    print("KERNEL_OK")
</pallas_src>

<mosaic_0001>
module attributes {stable_mosaic.version = 11 : i64} {
  func.func @_tdnn_kernel(%arg0: i32, %arg1: i32, %arg2: memref<1x16x8xf32, #tpu.memory_space<vmem>>, %arg3: memref<1x16x8xf32, #tpu.memory_space<vmem>>, %arg4: memref<1x16x8xf32, #tpu.memory_space<vmem>>, %arg5: memref<24x16xbf16, #tpu.memory_space<vmem>>, %arg6: memref<3x16xf32, #tpu.memory_space<vmem>>, %arg7: memref<1x16x16xf32, #tpu.memory_space<vmem>>, %arg8: memref<48x8xbf16, #tpu.memory_space<vmem>>) attributes {dimension_semantics = [#tpu.dimension_semantics<parallel>, #tpu.dimension_semantics<parallel>], iteration_bounds = array<i64: 2, 1>, scalar_prefetch = 0 : i64, scratch_operands = 1 : i64, tpu.core_type = #tpu.core_type<tc>, window_params = [{transform_indices = @transform_0, window_bounds = array<i64: 1, 16, 8>}, {transform_indices = @transform_1, window_bounds = array<i64: 1, 16, 8>}, {transform_indices = @transform_2, window_bounds = array<i64: 1, 16, 8>}, {pipeline_mode = #tpu.pipeline_mode<synchronous>, transform_indices = @transform_3, window_bounds = array<i64: 24, 16>}, {pipeline_mode = #tpu.pipeline_mode<synchronous>, transform_indices = @transform_4, window_bounds = array<i64: 3, 16>}, {transform_indices = @transform_5, window_bounds = array<i64: 1, 16, 16>}]} {
    %c0 = arith.constant 0 : index
    %c0_0 = arith.constant 0 : index
    %c0_1 = arith.constant 0 : index
    %0 = vector.load %arg3[%c0, %c0_0, %c0_1] : memref<1x16x8xf32, #tpu.memory_space<vmem>>, vector<1x16x8xf32>
    %1 = vector.shape_cast %0 : vector<1x16x8xf32> to vector<16x8xf32>
    %2 = arith.truncf %1 : vector<16x8xf32> to vector<16x8xbf16>
    %3 = tpu.iota {dimensions = array<i32: 0>} : vector<16x1xi32>
    %c16_i32 = arith.constant 16 : i32
    %4 = arith.muli %arg1, %c16_i32 : i32
    %c16_i32_2 = arith.constant 16 : i32
    %5 = arith.subi %4, %c16_i32_2 : i32
    %c0_i32 = arith.constant 0 : i32
    %6 = arith.addi %5, %c0_i32 : i32
    %7 = vector.broadcast %6 : i32 to vector<16x1xi32>
    %8 = arith.addi %7, %3 : vector<16x1xi32>
    %c0_i32_3 = arith.constant 0 : i32
    %9 = vector.broadcast %c0_i32_3 : i32 to vector<16x1xi32>
    %10 = arith.cmpi sge, %8, %9 : vector<16x1xi32>
    %c16_i32_4 = arith.constant 16 : i32
    %11 = vector.broadcast %c16_i32_4 : i32 to vector<16x1xi32>
    %12 = arith.cmpi slt, %8, %11 : vector<16x1xi32>
    %13 = arith.andi %10, %12 : vector<16x1xi1>
    %cst = arith.constant 0.000000e+00 : bf16
    %14 = vector.broadcast %cst : bf16 to vector<16x8xbf16>
    %15 = vector.shape_cast %13 : vector<16x1xi1> to vector<16x1xi1>
    %16 = vector.broadcast %15 : vector<16x1xi1> to vector<16x8xi1>
    %17 = arith.select %16, %2, %14 : vector<16x8xi1>, vector<16x8xbf16>
    %c0_5 = arith.constant 0 : index
    %c0_6 = arith.constant 0 : index
    %18 = vector.load %arg8[%c0_5, %c0_6] : memref<48x8xbf16, #tpu.memory_space<vmem>>, vector<16x8xbf16>
    tpu.vector_store %arg8[%c0_5, %c0_6], %17 {strides = array<i32>} : memref<48x8xbf16, #tpu.memory_space<vmem>>, vector<16x8xbf16>,
    %c0_7 = arith.constant 0 : index
    %c0_8 = arith.constant 0 : index
    %c0_9 = arith.constant 0 : index
    %19 = vector.load %arg2[%c0_7, %c0_8, %c0_9] : memref<1x16x8xf32, #tpu.memory_space<vmem>>, vector<1x16x8xf32>
    %20 = vector.shape_cast %19 : vector<1x16x8xf32> to vector<16x8xf32>
    %21 = arith.truncf %20 : vector<16x8xf32> to vector<16x8xbf16>
    %22 = tpu.iota {dimensions = array<i32: 0>} : vector<16x1xi32>
    %c16_i32_10 = arith.constant 16 : i32
    %23 = arith.muli %arg1, %c16_i32_10 : i32
    %c16_i32_11 = arith.constant 16 : i32
    %24 = arith.subi %23, %c16_i32_11 : i32
    %c16_i32_12 = arith.constant 16 : i32
    %25 = arith.addi %24, %c16_i32_12 : i32
    %26 = vector.broadcast %25 : i32 to vector<16x1xi32>
    %27 = arith.addi %26, %22 : vector<16x1xi32>
    %c0_i32_13 = arith.constant 0 : i32
    %28 = vector.broadcast %c0_i32_13 : i32 to vector<16x1xi32>
    %29 = arith.cmpi sge, %27, %28 : vector<16x1xi32>
    %c16_i32_14 = arith.constant 16 : i32
    %30 = vector.broadcast %c16_i32_14 : i32 to vector<16x1xi32>
    %31 = arith.cmpi slt, %27, %30 : vector<16x1xi32>
    %32 = arith.andi %29, %31 : vector<16x1xi1>
    %cst_15 = arith.constant 0.000000e+00 : bf16
    %33 = vector.broadcast %cst_15 : bf16 to vector<16x8xbf16>
    %34 = vector.shape_cast %32 : vector<16x1xi1> to vector<16x1xi1>
    %35 = vector.broadcast %34 : vector<16x1xi1> to vector<16x8xi1>
    %36 = arith.select %35, %21, %33 : vector<16x8xi1>, vector<16x8xbf16>
    %c16 = arith.constant 16 : index
    %c0_16 = arith.constant 0 : index
    %37 = vector.load %arg8[%c16, %c0_16] : memref<48x8xbf16, #tpu.memory_space<vmem>>, vector<16x8xbf16>
    tpu.vector_store %arg8[%c16, %c0_16], %36 {strides = array<i32>} : memref<48x8xbf16, #tpu.memory_space<vmem>>, vector<16x8xbf16>,
    %c0_17 = arith.constant 0 : index
    %c0_18 = arith.constant 0 : index
    %c0_19 = arith.constant 0 : index
    %38 = vector.load %arg4[%c0_17, %c0_18, %c0_19] : memref<1x16x8xf32, #tpu.memory_space<vmem>>, vector<1x16x8xf32>
    %39 = vector.shape_cast %38 : vector<1x16x8xf32> to vector<16x8xf32>
    %40 = arith.truncf %39 : vector<16x8xf32> to vector<16x8xbf16>
    %41 = tpu.iota {dimensions = array<i32: 0>} : vector<16x1xi32>
    %c16_i32_20 = arith.constant 16 : i32
    %42 = arith.muli %arg1, %c16_i32_20 : i32
    %c16_i32_21 = arith.constant 16 : i32
    %43 = arith.subi %42, %c16_i32_21 : i32
    %c32_i32 = arith.constant 32 : i32
    %44 = arith.addi %43, %c32_i32 : i32
    %45 = vector.broadcast %44 : i32 to vector<16x1xi32>
    %46 = arith.addi %45, %41 : vector<16x1xi32>
    %c0_i32_22 = arith.constant 0 : i32
    %47 = vector.broadcast %c0_i32_22 : i32 to vector<16x1xi32>
    %48 = arith.cmpi sge, %46, %47 : vector<16x1xi32>
    %c16_i32_23 = arith.constant 16 : i32
    %49 = vector.broadcast %c16_i32_23 : i32 to vector<16x1xi32>
    %50 = arith.cmpi slt, %46, %49 : vector<16x1xi32>
    %51 = arith.andi %48, %50 : vector<16x1xi1>
    %cst_24 = arith.constant 0.000000e+00 : bf16
    %52 = vector.broadcast %cst_24 : bf16 to vector<16x8xbf16>
    %53 = vector.shape_cast %51 : vector<16x1xi1> to vector<16x1xi1>
    %54 = vector.broadcast %53 : vector<16x1xi1> to vector<16x8xi1>
    %55 = arith.select %54, %40, %52 : vector<16x8xi1>, vector<16x8xbf16>
    %c32 = arith.constant 32 : index
    %c0_25 = arith.constant 0 : index
    %56 = vector.load %arg8[%c32, %c0_25] : memref<48x8xbf16, #tpu.memory_space<vmem>>, vector<16x8xbf16>
    tpu.vector_store %arg8[%c32, %c0_25], %55 {strides = array<i32>} : memref<48x8xbf16, #tpu.memory_space<vmem>>, vector<16x8xbf16>,
    %cst_26 = arith.constant 0.000000e+00 : f32
    %57 = vector.broadcast %cst_26 : f32 to vector<16x16xf32>
    %c15 = arith.constant 15 : index
    %c0_27 = arith.constant 0 : index
    %58 = vector.load %arg8[%c15, %c0_27] : memref<48x8xbf16, #tpu.memory_space<vmem>>, vector<16x8xbf16>
    %c0_28 = arith.constant 0 : index
    %c0_29 = arith.constant 0 : index
    %59 = vector.load %arg5[%c0_28, %c0_29] : memref<24x16xbf16, #tpu.memory_space<vmem>>, vector<8x16xbf16>
    %cst_30 = arith.constant dense<0.000000e+00> : vector<16x16xf32>
    %60 = tpu.matmul %58, %59, %cst_30 {dimension_numbers = #tpu.dot_dimension_numbers<[1], [0], [0], [1], [0, 0, 1, 1], [], []>} : vector<16x8xbf16>, vector<8x16xbf16>, vector<16x16xf32> -> vector<16x16xf32>
    %61 = arith.addf %57, %60 : vector<16x16xf32>
    %c16_31 = arith.constant 16 : index
    %c0_32 = arith.constant 0 : index
    %62 = vector.load %arg8[%c16_31, %c0_32] : memref<48x8xbf16, #tpu.memory_space<vmem>>, vector<16x8xbf16>
    %c8 = arith.constant 8 : index
    %c0_33 = arith.constant 0 : index
    %63 = vector.load %arg5[%c8, %c0_33] : memref<24x16xbf16, #tpu.memory_space<vmem>>, vector<8x16xbf16>
    %cst_34 = arith.constant dense<0.000000e+00> : vector<16x16xf32>
    %64 = tpu.matmul %62, %63, %cst_34 {dimension_numbers = #tpu.dot_dimension_numbers<[1], [0], [0], [1], [0, 0, 1, 1], [], []>} : vector<16x8xbf16>, vector<8x16xbf16>, vector<16x16xf32> -> vector<16x16xf32>
    %65 = arith.addf %61, %64 : vector<16x16xf32>
    %c17 = arith.constant 17 : index
    %c0_35 = arith.constant 0 : index
    %66 = vector.load %arg8[%c17, %c0_35] : memref<48x8xbf16, #tpu.memory_space<vmem>>, vector<16x8xbf16>
    %c16_36 = arith.constant 16 : index
    %c0_37 = arith.constant 0 : index
    %67 = vector.load %arg5[%c16_36, %c0_37] : memref<24x16xbf16, #tpu.memory_space<vmem>>, vector<8x16xbf16>
    %cst_38 = arith.constant dense<0.000000e+00> : vector<16x16xf32>
    %68 = tpu.matmul %66, %67, %cst_38 {dimension_numbers = #tpu.dot_dimension_numbers<[1], [0], [0], [1], [0, 0, 1, 1], [], []>} : vector<16x8xbf16>, vector<8x16xbf16>, vector<16x16xf32> -> vector<16x16xf32>
    %69 = arith.addf %65, %68 : vector<16x16xf32>
    %c0_39 = arith.constant 0 : index
    %c0_40 = arith.constant 0 : index
    %70 = vector.load %arg6[%c0_39, %c0_40] : memref<3x16xf32, #tpu.memory_space<vmem>>, vector<1x16xf32>
    %71 = vector.broadcast %70 : vector<1x16xf32> to vector<16x16xf32>
    %72 = arith.addf %69, %71 : vector<16x16xf32>
    %cst_41 = arith.constant 0.000000e+00 : f32
    %73 = vector.broadcast %cst_41 : f32 to vector<16x16xf32>
    %74 = arith.maximumf %72, %73 : vector<16x16xf32>
    %cst_42 = arith.constant dense<0.000000e+00> : vector<16xf32>
    %75 = vector.multi_reduction <add>, %74, %cst_42 [1] : vector<16x16xf32> to vector<16xf32>
    %76 = vector.shape_cast %75 : vector<16xf32> to vector<16x1xf32>
    %77 = arith.mulf %74, %74 : vector<16x16xf32>
    %cst_43 = arith.constant dense<0.000000e+00> : vector<16xf32>
    %78 = vector.multi_reduction <add>, %77, %cst_43 [1] : vector<16x16xf32> to vector<16xf32>
    %79 = vector.shape_cast %78 : vector<16xf32> to vector<16x1xf32>
    %cst_44 = arith.constant 6.250000e-02 : f32
    %80 = vector.broadcast %cst_44 : f32 to vector<16x1xf32>
    %81 = arith.mulf %76, %80 : vector<16x1xf32>
    %cst_45 = arith.constant 6.250000e-02 : f32
    %82 = vector.broadcast %cst_45 : f32 to vector<16x1xf32>
    %83 = arith.mulf %79, %82 : vector<16x1xf32>
    %84 = arith.mulf %81, %81 : vector<16x1xf32>
    %85 = arith.subf %83, %84 : vector<16x1xf32>
    %cst_46 = arith.constant 0.000000e+00 : f32
    %86 = vector.broadcast %cst_46 : f32 to vector<16x1xf32>
    %87 = arith.maximumf %85, %86 : vector<16x1xf32>
    %88 = vector.broadcast %81 : vector<16x1xf32> to vector<16x16xf32>
    %89 = arith.subf %74, %88 : vector<16x16xf32>
    %cst_47 = arith.constant 9.99999974E-6 : f32
    %90 = vector.broadcast %cst_47 : f32 to vector<16x1xf32>
    %91 = arith.addf %87, %90 : vector<16x1xf32>
    %92 = math.rsqrt %91 : vector<16x1xf32>
    %93 = vector.broadcast %92 : vector<16x1xf32> to vector<16x16xf32>
    %94 = arith.mulf %89, %93 : vector<16x16xf32>
    %c1 = arith.constant 1 : index
    %c0_48 = arith.constant 0 : index
    %95 = vector.load %arg6[%c1, %c0_48] : memref<3x16xf32, #tpu.memory_space<vmem>>, vector<1x16xf32>
    %96 = vector.broadcast %95 : vector<1x16xf32> to vector<16x16xf32>
    %97 = arith.mulf %94, %96 : vector<16x16xf32>
    %c2 = arith.constant 2 : index
    %c0_49 = arith.constant 0 : index
    %98 = vector.load %arg6[%c2, %c0_49] : memref<3x16xf32, #tpu.memory_space<vmem>>, vector<1x16xf32>
    %99 = vector.broadcast %98 : vector<1x16xf32> to vector<16x16xf32>
    %100 = arith.addf %97, %99 : vector<16x16xf32>
    %c0_50 = arith.constant 0 : index
    %c0_51 = arith.constant 0 : index
    %c0_52 = arith.constant 0 : index
    %101 = vector.load %arg7[%c0_50, %c0_51, %c0_52] : memref<1x16x16xf32, #tpu.memory_space<vmem>>, vector<1x16x16xf32>
    %102 = vector.shape_cast %101 : vector<1x16x16xf32> to vector<16x16xf32>
    %103 = vector.shape_cast %100 : vector<16x16xf32> to vector<1x16x16xf32>
    tpu.vector_store %arg7[%c0_50, %c0_51, %c0_52], %103 {strides = array<i32>} : memref<1x16x16xf32, #tpu.memory_space<vmem>>, vector<1x16x16xf32>,
    return
  }
  func.func @transform_0(%arg0: i32, %arg1: i32) -> (i32, i32, i32) {
    %c0_i32 = arith.constant 0 : i32
    %c0_i32_0 = arith.constant 0 : i32
    return %arg0, %arg1, %c0_i32 : i32, i32, i32
  }
  func.func @transform_1(%arg0: i32, %arg1: i32) -> (i32, i32, i32) {
    %c1_i32 = arith.constant 1 : i32
    %0 = arith.muli %arg1, %c1_i32 : i32
    %c1_i32_0 = arith.constant 1 : i32
    %1 = arith.subi %0, %c1_i32_0 : i32
    %c0_i32 = arith.constant 0 : i32
    %2 = arith.maxsi %1, %c0_i32 : i32
    %c0_i32_1 = arith.constant 0 : i32
    %c0_i32_2 = arith.constant 0 : i32
    return %arg0, %2, %c0_i32_1 : i32, i32, i32
  }
  func.func @transform_2(%arg0: i32, %arg1: i32) -> (i32, i32, i32) {
    %c1_i32 = arith.constant 1 : i32
    %0 = arith.addi %arg1, %c1_i32 : i32
    %c1_i32_0 = arith.constant 1 : i32
    %1 = arith.muli %0, %c1_i32_0 : i32
    %c0_i32 = arith.constant 0 : i32
    %2 = arith.minsi %1, %c0_i32 : i32
    %c0_i32_1 = arith.constant 0 : i32
    %c0_i32_2 = arith.constant 0 : i32
    return %arg0, %2, %c0_i32_1 : i32, i32, i32
  }
  func.func @transform_3(%arg0: i32, %arg1: i32) -> (i32, i32) {
    %c0_i32 = arith.constant 0 : i32
    %c0_i32_0 = arith.constant 0 : i32
    %c0_i32_1 = arith.constant 0 : i32
    return %c0_i32, %c0_i32_0 : i32, i32
  }
  func.func @transform_4(%arg0: i32, %arg1: i32) -> (i32, i32) {
    %c0_i32 = arith.constant 0 : i32
    %c0_i32_0 = arith.constant 0 : i32
    %c0_i32_1 = arith.constant 0 : i32
    return %c0_i32, %c0_i32_0 : i32, i32
  }
  func.func @transform_5(%arg0: i32, %arg1: i32) -> (i32, i32, i32) {
    %c0_i32 = arith.constant 0 : i32
    %c0_i32_0 = arith.constant 0 : i32
    return %arg0, %arg1, %c0_i32 : i32, i32, i32
  }
}

</mosaic_0001>

<bundles_post_ra>
// kernel: tpu_custom_call.1
= control target key start
LH: loop header
LB: loop body
LE: loop exit
PB: predicated region body
PF: predicated region fallthrough
CT: control target
= control target key end

     0   :  { %10 = vsyncpa [#allocation4], 0  ;;  %s1216_s0 = inlined_call_operand.vmem [shape: f32[2,16,8], index: 0, kind: input, shape index: {}]   ;;  %s1217_s1 = inlined_call_operand.vmem [shape: f32[2,16,8], index: 1, kind: input, shape index: {}]   ;;  %s1218_s2 = inlined_call_operand.vmem [shape: f32[2,16,8], index: 2, kind: input, shape index: {}]   ;;  %s1219_s3 = inlined_call_operand.vmem [shape: bf16[24,16], index: 3, kind: input, shape index: {}]   ;;  %s1220_s4 = inlined_call_operand.vmem [shape: f32[3,16], index: 4, kind: input, shape index: {}]   ;;  %s1221_s5 = inlined_call_operand.hbm [shape: f32[2,16,16], index: 5, kind: output, shape index: {}]  }
   0x1   :  { %12 = vsyncpa [#allocation4 + $0x1], 0  ;;  %s1057_s18 = smov 0   ;;  %s1059_s19 = smov 0  }
   0x2   :  { %s1061_s20 = smov 0   ;;  %s1063_s21 = smov 0  }
   0x3   :  { %s1065_s22 = smov 0   ;;  %s1067_s23 = smov 0  }
   0x4 LB: > { %s821_s24 = sadd.s32 4294967295, %s1018_s23   ;;  %s822_s25 = sadd.s32 4294967294, %s1018_s23   ;;  %s1018_s23 = sphi %s1067_s23, %s18_s23   ;;  %s1014_s22 = sphi %s1065_s22, %s1228_s22   ;;  %s1010_s21 = sphi %s1063_s21, %s1227_s21   ;;  %s1006_s20 = sphi %s1061_s20, %s1226_s20   ;;  %s1002_s19 = sphi %s1059_s19, %s1225_s19   ;;  %s998_s18 = sphi %s1057_s18, %s1224_s18  }
   0x5   : > { %s30_s26 = sadd.s32 1, %s1014_s22  ;;  %s177_s27 = sadd.s32 1, %s1006_s20 }
   0x6   : > { %p32_p0 = scmp.ge.s32.totalorder %s30_s26, 2  ;;  %p187_p1 = scmp.ne.s32.totalorder %s1006_s20, %s1002_s19 }
   0x7   : > { %p188_p2 = scmp.eq.s32.totalorder %s821_s24, 1  ;;  %p193_p3 = scmp.ne.s32.totalorder %s1002_s19, %s998_s18 }
   0x8   : > { %s1230_s26 = smov (%p32_p0, %s30_s26), 0  ;;  %p194_p5 = scmp.eq.s32.totalorder %s822_s25, 1 }
   0x9   : > { %p1097_p4 = por %p188_p2, %p187_p1  ;;  %s172_s29 = ssub.s32 %s1014_s22, %s1230_s26 }
   0xa   : > { %p825_p6 = scmp.ge.s32.totalorder %s1018_s23, 1  ;;  %p175_p7 = scmp.eq.s32.totalorder %s172_s29, 0 }
   0xb   : > { %p1104_p8 = por %p194_p5, %p193_p3  ;;  %p269_p9 = scmp.lt.s32.totalorder %s1018_s23, 3 }
   0xc   : > { %s1110_s6 = scalar_select %p175_p7, %s1006_s20, %s177_s27  }
   0xd   : > { %p270_p10 = pnand %p825_p6, %p269_p9 }
   0xe   : > { %v459_v0 = vld [vmem:[%s1219_s3 + $0x4] sm:$0xf] (!%p270_p10)  ;;  %vm463_vm0 = vcmask (!%p270_p10), 1043456   ;;  %p326_p11 = scmp.lt.s32.totalorder (!%p270_p10), %s1010_s21, 1  ;;  %v1020_v1 = vmov (!%p270_p10), 0.0   ;;  %vm1021_vm1 = vmmov (!%p270_p10), 0  }
   0xf   : > { %273 = sbr.rel (%p270_p10) target bundleno = 455 (0x1c7), region = 40  ;;  %857 = vmatprep.subr.bf16.mxu0 (!%p270_p10), %v1020_v1  ;;  %v465_v2 = vsel (!%p270_p10), %vm463_vm0, %v459_v0, 0  ;;  %vm392_vm2 = vmpackc.low (!%p270_p10), %vm1021_vm1, %vm1021_vm1  ;;  %859 = vmatprep.mubr.msk.bf16.mxu0 (!%p270_p10), %vm1021_vm1, %v1020_v1  ;;  %v1022_v3 = vmov (!%p270_p10), 0   ;;  %vm1023_vm3 = vmmov (!%p270_p10), 1   ;;  %v458_v5 = vld [vmem:[%s1219_s3] sm:$0xf] (!%p270_p10) }
  0x10   : > { %858 = vmatpush3.bf16.msra.mxu0 (!%p270_p10), %v465_v2  ;;  %v394_v4 = vsel (!%p270_p10), %vm392_vm2, 65537, %v1022_v3  ;;  %vm419_vm4 = vmpackc.low (!%p270_p10), %vm1023_vm3, %vm1023_vm3  ;;  %863 = vmatprep.subr.bf16.mxu1 (!%p270_p10), %v1020_v1  ;;  %v524_v8 = vsel (!%p270_p10), %vm463_vm0, %v458_v5, 0  ;;  %vm401_vm7 = vcmask (!%p270_p10), 64512   ;;  %v569_v22 = vld [vmem:[%s1219_s3 + $0x8] sm:$0xf] (!%p270_p10)  ;;  %vm641_vm10 = vcmask (!%p270_p10), 130048  }
  0x11   : > { %v833_v6 = vcombine.low (!%p270_p10), %v394_v4, %v394_v4  ;;  %v421_v7 = vsel (!%p270_p10), %vm419_vm4, 65537, %v1022_v3  ;;  %869 = vmatprep.subr.bf16.mxu0 (!%p270_p10), %v1020_v1  ;;  %865 = vmatprep.mubr.msk.bf16.mxu1 (!%p270_p10), %vm1021_vm1, %v1020_v1  ;;  %v587_v23 = vsel (!%p270_p10), %vm463_vm0, %v569_v22, 0  ;;  %vm508_vm8 = vsmask.f32 (!%p270_p10), 256  ;;  %v839_v47 = vld [vmem:[%s1220_s4] ss:$0 sm:$0xff] (!%p270_p10) }
  0x12   : > { %v834_v9 = vcombine.low (!%p270_p10), %v421_v7, %v421_v7  ;;  %864 = vmatpush3.bf16.msra.mxu1 (!%p270_p10), %v524_v8  ;;  %vm570_vm9 = vsmask.f32 (!%p270_p10), 7424  ;;  %s322_s11 = sand.u32 (!%p270_p10), 1, %s1002_s19   ;;  %v841_v22 = vld [vmem:[%s1220_s4 + $0x2] ss:$0 sm:$0xff] (!%p270_p10)  ;;  %s850_s17 = sshll.u32 (!%p270_p10), %s1010_s21, 8 }
  0x13   : > { %vm399_vm5 = vcmp.ne.s16.totalorder (!%p270_p10), %v833_v6, 0  ;;  %s826_s14 = sshll.u32 (!%p270_p10), %s322_s11, 4  ;;  %s1165_s7 = scalar_lea.hbm (!%p270_p10), %s1221_s5, %s850_s17 }
  0x14   : > { %vm426_vm6 = vcmp.ne.s16.totalorder (!%p270_p10), %v834_v9, 0  ;;  %s1170_s8 = scalar_lea.sflag (!%p270_p10), [#allocation4], %s322_s11 }
  0x16   : > { %s327_s9 = scalar_select %p326_p11, %s1010_s21, 1 }
  0x18   : > { %s847_s12 = sshll.u32 %s327_s9, 4  ;;  %s1024_s9 = smov [#allocation3]  }
  0x19   : > { %s333_s15 = scalar_lea.vmem %s1216_s0, %s847_s12  ;;  %s346_s24 = scalar_lea.vmem %s1217_s1, %s847_s12 }
  0x1a   : > { %s362_s29 = scalar_lea.vmem %s1218_s2, %s847_s12  ;;  %v371_v10 = vld [vmem:[%s346_s24] sm:$0xff]  ;;  %v372_v11 = vld [vmem:[%s346_s24 + $0x8] sm:$0xff]  ;;  %s324_s24 = scalar_lea.vmem [#allocation3], %s826_s14 }
  0x1b   : > { %v403_v12 = vld [vmem:[%s333_s15] sm:$0xff]  ;;  %v373_v13 = vpack.c.bf16 %v372_v11, %v371_v10  ;;  %v404_v14 = vld [vmem:[%s333_s15 + $0x8] sm:$0xff]  ;;  %s706_s25 = sshll.u32 %s324_s24, 4  ;;  %s944_s10 = sshll.u32 %s1024_s9, 4  ;;  %s1167_s25 = int_to_ptr.vmem [resolvable:$true] %s706_s25  ;;  %s945_s10 = int_to_ptr.vmem [resolvable:$false] %s944_s10 }
  0x1c   : > { %v429_v15 = vld [vmem:[%s362_s29] sm:$0xff]  ;;  %v430_v16 = vld [vmem:[%s362_s29 + $0x8] sm:$0xff]  ;;  %v405_v17 = vpack.c.bf16 %v404_v14, %v403_v12  ;;  %s940_s21 = scalar_lea.vmem %s1167_s25, 256  ;;  %s946_s12 = scalar_lea.vmem %s945_s10, 512 }
  0x1d   : > { %v431_v18 = vpack.c.bf16 %v430_v16, %v429_v15  ;;  %v400_v19 = vsel %vm399_vm5, %v373_v13, 0  ;;  %p941_p12 = scmp.ne.s32.totalorder %s1167_s25, %s940_s21  ;;  %p947_p1 = scmp.lt.s32.totalorder %s1167_s25, %s945_s10 }
  0x1e   : > { %v427_v20 = vsel %vm426_vm6, %v405_v17, 0  ;;  %402 = vst.msk [vmem:[#allocation2] sm:$0xff] %vm401_vm7, %v400_v19  ;;  %p948_p2 = scmp.lt.s32.totalorder %s946_s12, %s940_s21 }
  0x1f   : > { %v454_v21 = vsel %vm399_vm5, %v431_v18, 0  ;;  %428 = vst.msk [vmem:[#allocation2 + $0x8] sm:$0xff] %vm401_vm7, %v427_v20  ;;  %v840_v20 = vld [vmem:[%s1220_s4 + $0x1] ss:$0 sm:$0xff]  ;;  %p942_p13 = pnand %p941_p12, %p1097_p4 }
  0x20   : > { %455 = vst.msk [vmem:[#allocation2 + $0x10] sm:$0xff] %vm401_vm7, %v454_v21  ;;  %p949_p3 = por %p948_p2, %p947_p1 }
  0x21   : > { %p943_p0 = pneg %p942_p13 }
  0x23   : > { %p950_p5 = pnand %p949_p3, %p943_p0 }
  0x25   : > { %v456_v24 = vld [vmem:[#allocation2] sm:$0x80] }
  0x26   : > { %v457_v25 = vld [vmem:[#allocation2 + $0x8] sm:$0xff]  ;;  %v510_v26 = vshrl.u32 %v456_v24, 16 }
  0x27   : > { %v568_v27 = vld [vmem:[#allocation2 + $0x10] sm:$0x1]  ;;  %860 = vmatmul.mubr.msk.bf16.vlgmr.msra.gmra.mrb[0].mxu0 %vm401_vm7, %v457_v25  ;;  %v513_v28 = vshrl.u32 %v457_v25, 16  ;;  %v516_v29 = vshll.u32 %v457_v25, 16 }
  0x28   : > { %v579_v30 = vshll.u32 %v568_v27, 16  ;;  %870 = vmatpush3.bf16.msra.mxu0 %v587_v23  ;;  %871 = vmatprep.mubr.msk.bf16.mxu0 %vm1021_vm1, %v1020_v1  ;;  %v512_v32 = vrot.slane %v510_v26, 7 }
  0x29   : > { %v515_v31 = vrot.slane %v513_v28, 7  ;;  %v576_v33 = vrot.slane %v516_v29, 1 }
  0x2a   : > { %v581_v34 = vrot.slane %v579_v30, 1 }
  0x2b   : > { %v518_v35 = vor.u32 %v516_v29, %v515_v31  ;;  %v577_v36 = vor.u32 %v576_v33, %v513_v28 }
  0x2d   : > { %v519_v37 = vsel %vm508_vm8, %v512_v32, %v518_v35  ;;  %v582_v38 = vsel %vm570_vm9, %v577_v36, %v581_v34 }
  0x2e   : > { %866 = vmatmul.mubr.msk.bf16.vlgmr.msra.gmra.mrb[0].mxu1 %vm401_vm7, %v519_v37 }
  0x2f   : > { %872 = vmatmul.mubr.msk.bf16.vlgmr.msra.gmra.mrb[4].mxu0 %vm401_vm7, %v582_v38 }
  0xfa   : > { %v501_v39 = vpop.f32.mrb[0].mxu0 }
  0xfb   : > { %v861_v40 = vpop.f32.mrb[1].mxu0 }
  0xfc   : > { %v504_v41 = vpop.f32.mrb[2].mxu0 }
  0xfd   : > { %v862_v42 = vpop.f32.mrb[3].mxu0 }
 0x101   : > { %v560_v43 = vpop.f32.mrb[0].mxu1 }
 0x102   : > { %v561_v44 = vadd.f32 %v560_v43, %v501_v39  ;;  %v867_v45 = vpop.f32.mrb[1].mxu1  ;;  %v623_v46 = vpop.f32.mrb[4].mxu0 }
 0x103   : > { %v563_v48 = vpop.f32.mrb[2].mxu1  ;;  %v873_v49 = vpop.f32.mrb[5].mxu0 }
 0x104   : > { %v630_v50 = vadd.f32 %v623_v46, %v561_v44  ;;  %v564_v51 = vadd.f32 %v563_v48, %v504_v41  ;;  %v868_v52 = vpop.f32.mrb[3].mxu1  ;;  %v626_v53 = vpop.f32.mrb[6].mxu0 }
 0x105   : > { %v874_v54 = vpop.f32.mrb[7].mxu0 }
 0x106   : > { %v637_v55 = vadd.f32 %v839_v47, %v630_v50  ;;  %v631_v56 = vadd.f32 %v626_v53, %v564_v51 }
 0x108   : > { %v639_v57 = vmax.f32 %v637_v55, 0.0  ;;  %v638_v58 = vadd.f32 %v839_v47, %v631_v56 }
 0x10a   : > { %v640_v59 = vmax.f32 %v638_v58, 0.0  ;;  %v642_v60 = vsel %vm641_vm10, %v639_v57, 0.0  ;;  %v648_v61 = vmul.f32 %v639_v57, %v639_v57 }
 0x10b   : > { %643 = vadd.xlane.f32.xlu0 %v642_v60 }
 0x10c   : > { %v650_v62 = vsel %vm641_vm10, %v648_v61, 0.0  ;;  %v649_v63 = vmul.f32 %v640_v59, %v640_v59  ;;  %v645_v0 = vsel %vm641_vm10, %v640_v59, 0.0 }
 0x10d   : > { %651 = vadd.xlane.f32.xlu1 %v650_v62 }
 0x10e   : > { %v653_v1 = vsel %vm641_vm10, %v649_v63, 0.0 }
 0x10f   : > { %646 = vadd.xlane.f32.xlu0 %v645_v0 }
 0x111   : > { %654 = vadd.xlane.f32.xlu1 %v653_v1 }
 0x198   : > { %v644_v2 = vpop.xlane.xlu0 %643 }
 0x199   : > { %v656_v3 = vmul.f32 0.0625, %v644_v2 }
 0x19a   : > { %v652_v4 = vpop.xlane.xlu1 %651 }
 0x19b   : > { %v660_v5 = vmul.f32 %v656_v3, %v656_v3  ;;  %v658_v6 = vmul.f32 0.0625, %v652_v4  ;;  %v666_v18 = vsub.f32 %v639_v57, %v656_v3 }
 0x19c   : > { %v647_v7 = vpop.xlane.xlu0 %646 }
 0x19d   : > { %v662_v8 = vsub.f32 %v658_v6, %v660_v5  ;;  %v657_v9 = vmul.f32 0.0625, %v647_v7 }
 0x19e   : > { %v655_v10 = vpop.xlane.xlu1 %654 }
 0x19f   : > { %v664_v11 = vmax.f32 %v662_v8, 0.0  ;;  %v661_v12 = vmul.f32 %v657_v9, %v657_v9  ;;  %v659_v13 = vmul.f32 0.0625, %v655_v10  ;;  %v667_v24 = vsub.f32 %v640_v59, %v657_v9 }
 0x1a1   : > { %v668_v14 = vadd.f32 1e-05, %v664_v11  ;;  %v663_v15 = vsub.f32 %v659_v13, %v661_v12 }
 0x1a3   : > { %936 = vrsqrt.f32 %v668_v14  ;;  %v665_v16 = vmax.f32 %v663_v15, 0.0 }
 0x1a5   : > { %v669_v17 = vadd.f32 1e-05, %v665_v16 }
 0x1a7   : > { %938 = vrsqrt.f32 %v669_v17 }
 0x1ad   : > { %v937_v19 = vpop.eup %936 }
 0x1ae   : > { %v672_v21 = vmul.f32 %v937_v19, %v666_v18 }
 0x1b0   : > { %v679_v23 = vmul.f32 %v840_v20, %v672_v21 }
 0x1b1   : > { %v939_v25 = vpop.eup %938 }
 0x1b2   : > { %v673_v26 = vmul.f32 %v939_v25, %v667_v24  ;;  %v686_v27 = vadd.f32 %v841_v22, %v679_v23 }
 0x1b4   : > { %v680_v28 = vmul.f32 %v840_v20, %v673_v26  ;;  %688 = vst.msk [vmem:[%s324_s24] sm:$0xff] %vm641_vm10, %v686_v27 }
 0x1b6   : > { %v687_v29 = vadd.f32 %v841_v22, %v680_v28 }
 0x1b8   : > { %689 = vst.msk [vmem:[%s324_s24 + $0x8] sm:$0xff] %vm641_vm10, %v687_v29 }
 0x1b9   : > { %953 = shalt.err (!%p950_p5)
}
 0x1ba   : > { %s954_s11 = scalar_lea.hbm %s1165_s7, 256  ;;  %s958_s15 = scalar_lea.hbm %s1221_s5, 512 }
 0x1bb   : > { %p955_p6 = scmp.ne.s32.totalorder %s1165_s7, %s954_s11  ;;  %p959_p10 = scmp.lt.u32.totalorder %s1165_s7, %s1221_s5 }
 0x1bc   : > { %p960_p11 = scmp.lt.u32.totalorder %s958_s15, %s954_s11  ;;  %p962_p13 = scmp.lt.u32.totalorder %s954_s11, %s1165_s7 }
 0x1bd   : > { %p956_p7 = pnand %p955_p6, %p1097_p4 }
 0x1be   : > { %p961_p12 = por %p960_p11, %p959_p10 }
 0x1bf   : > { %p957_p9 = pneg %p956_p7 }
 0x1c0   : > { %p963_p0 = por %p962_p13, %p961_p12 }
 0x1c2   : > { %p964_p1 = pnand %p963_p0, %p957_p9 }
 0x1c4   : > { %967 = shalt.err (!%p964_p1)
}
 0x1c5   : > { %s1025_s24 = smov 128   ;;  %s1026_s27 = smov 8  }
 0x1c6   : > { %875 = dma.vmem_to_hbm [thread:$0]  (%p1097_p4), %s1167_s25, 256, %s1165_s7, %s1170_s8, %s1025_s24, %s1025_s24, %s1026_s27  }
 0x1c7 PF: > { %p881_p2 = scmp.ge.s32.totalorder %s1018_s23, 2  ;;  %s721_s29 = sand.u32 1, %s998_s18  }
 0x1c8   : > { %s722_s21 = scalar_lea.sflag [#allocation4], %s721_s29 }
 0x1c9   : > { %p878_p3 = pnand %p881_p2, %p1104_p8 }
 0x1cb   : > { %993 = dma.done.wait (!%p878_p3), %s722_s21, 256  }
 0x1cc   : > { %995 = vsyncadd (!%p878_p3), %s722_s21, 4294967040  ;;  %s18_s23 = sadd.s32 1, %s1018_s23   ;;  %s1224_s18 = smov %s1002_s19 }
 0x1cd   : > { %p15_p5 = scmp.ge.s32.totalorder %s18_s23, 4   ;;  %s1225_s19 = smov %s1006_s20 }
 0x1ce   : > { %s1226_s20 = smov %s1110_s6  ;;  %s1227_s21 = smov %s1014_s22 }
 0x1cf   : > { %s1228_s22 = smov %s1230_s26  ;;  %17 = sbr.rel (!%p15_p5) target bundleno = 4 (0x4), region = 81 }
 0x1d6   :  { %727 = vsyncpa [#allocation4], 1 }
 0x1d7   :  { %729 = vsyncpa [#allocation4 + $0x1], 1 }

</bundles_post_ra>
